<compile_context>
chip_gen: v6e
topology: v6e:2x2x1
jax: 0.10.0
libtpu: 0.0.40
codegen_flags: <defaults>
</compile_context>

<pallas_src>
import functools

import jax
import jax.numpy as jnp
from jax import lax
from jax.experimental import pallas as pl
from jax.experimental.pallas import tpu as pltpu


def _round_up(x, m):
    return ((x + m - 1) // m) * m


def _lse_kernel(x_ref, lse_ref, m_ref, l_ref, *, k_dim, tile_k):
    """Streamed per-row logsumexp.

    x_ref   : (tile_b, tile_k) logits block (VMEM, native dtype)
    lse_ref : (tile_b, 1) per-row logsumexp, written on the last K block
    m_ref   : (tile_b, 1) running row max     (VMEM scratch, f32)
    l_ref   : (tile_b, 1) running sum of exp  (VMEM scratch, f32)
    """
    k = pl.program_id(1)          # class (K) block, reduction axis (last / "arbitrary")
    nk = pl.num_programs(1)

    @pl.when(k == 0)
    def _init():
        m_ref[...] = jnp.full_like(m_ref, -jnp.inf)
        l_ref[...] = jnp.zeros_like(l_ref)

    x = x_ref[...].astype(jnp.float32)

    # Ragged K edge: mask columns beyond k_dim (only compiled in when needed).
    if k_dim % tile_k != 0:
        limit = jnp.minimum(k_dim - k * tile_k, tile_k)          # scalar
        col = lax.broadcasted_iota(jnp.int32, x.shape, 1)
        x = jnp.where(col < limit, x, -jnp.inf)

    # Online logsumexp over the class axis.
    blk_max = jnp.max(x, axis=-1, keepdims=True)                 # (tile_b, 1)
    m_new = jnp.maximum(m_ref[...], blk_max)
    alpha = jnp.exp(m_ref[...] - m_new)
    p = jnp.exp(x - m_new)
    l_ref[...] = alpha * l_ref[...] + jnp.sum(p, axis=-1, keepdims=True)
    m_ref[...] = m_new

    @pl.when(k == nk - 1)
    def _finalize():
        lse_ref[...] = m_ref[...] + jnp.log(l_ref[...])


def nce_softmax_loss_ns(x, device=None, neighbors=None, *, tile_b=None, tile_k=None):
    """JAX/Pallas equivalent of NCESoftmaxLossNS.forward.

    x: (bsz, K, 1) or (bsz, K) logits.  `device` / `neighbors` are unused,
    matching the PyTorch forward (labels are arange(bsz) implicitly).
    Returns a scalar float32 loss.
    """
    if x.ndim == 3:
        x = jnp.squeeze(x, axis=-1)           # (bsz, K, 1) -> (bsz, K)
    bsz, k_dim = x.shape
    assert bsz <= k_dim, "labels arange(bsz) must be valid class indices"

    itemsize = jnp.dtype(x.dtype).itemsize
    min_sublane = {4: 8, 2: 16, 1: 32}.get(itemsize, 8)

    if tile_b is None:
        # Cap at 128 so a batch of 256 still yields 2 row blocks (v7x megacore).
        tile_b = min(_round_up(bsz, min_sublane), 128)
    else:
        tile_b = _round_up(tile_b, min_sublane)
    if tile_k is None:
        # 128 x 8192 f32 compute block = 4 MiB; double-buffered native-dtype
        # input + f32 temporaries fit comfortably under 48 MiB on all gens.
        tile_k = min(_round_up(k_dim, 128), 8192)
    else:
        tile_k = _round_up(tile_k, 128)

    grid = (pl.cdiv(bsz, tile_b), pl.cdiv(k_dim, tile_k))

    kernel = functools.partial(_lse_kernel, k_dim=k_dim, tile_k=tile_k)

    cost = pl.CostEstimate(
        flops=3 * bsz * k_dim,
        transcendentals=bsz * k_dim,
        bytes_accessed=bsz * k_dim * itemsize + bsz * 4,
    )

    lse = pl.pallas_call(
        kernel,
        out_shape=jax.ShapeDtypeStruct((bsz, 1), jnp.float32),
        grid_spec=pltpu.PrefetchScalarGridSpec(
            num_scalar_prefetch=0,
            grid=grid,
            in_specs=[pl.BlockSpec((tile_b, tile_k), lambda i, k: (i, k))],
            out_specs=pl.BlockSpec((tile_b, 1), lambda i, k: (i, 0)),
            scratch_shapes=[pltpu.VMEM((tile_b, 1), jnp.float32),   # running max
                            pltpu.VMEM((tile_b, 1), jnp.float32)],  # running sum
        ),
        compiler_params=pltpu.CompilerParams(
            dimension_semantics=("parallel", "arbitrary"),
            vmem_limit_bytes=48 * 1024 * 1024,
        ),
        cost_estimate=cost,
    )(x)

    # Target logits x[i, i]: tiny gather, cheapest done outside the kernel.
    idx = jnp.arange(bsz, dtype=jnp.int32)[:, None]
    tgt = jnp.take_along_axis(x, idx, axis=1)[:, 0].astype(jnp.float32)

    # loss_i = logsumexp(x_i) - x_i[i]; the PyTorch global-max shift cancels.
    return jnp.mean(lse[:, 0] - tgt)


def _reference(x):
    """Pure-JAX reference mirroring the PyTorch module."""
    if x.ndim == 3:
        x = jnp.squeeze(x, axis=-1)
    x = x.astype(jnp.float32)
    x = x - jnp.max(x)
    bsz = x.shape[0]
    lse = jax.scipy.special.logsumexp(x, axis=-1)
    tgt = x[jnp.arange(bsz), jnp.arange(bsz)]
    return jnp.mean(lse - tgt)


if __name__ == "__main__":
    key = jax.random.PRNGKey(0)

    # Case 1: bsz=8, K=384, f32 — single K block, default tiles.
    x1 = jax.random.normal(key, (8, 384, 1), dtype=jnp.float32)
    out1 = jax.block_until_ready(nce_softmax_loss_ns(x1, device=None, neighbors=None))
    ref1 = _reference(x1)
    assert jnp.allclose(out1, ref1, atol=1e-5, rtol=1e-5), (out1, ref1)

    # Case 2: same input, forced multi-block K — exercises the online
    # logsumexp accumulators and the init/finalize path.
    out2 = jax.block_until_ready(nce_softmax_loss_ns(x1, tile_b=8, tile_k=128))
    assert jnp.allclose(out2, ref1, atol=1e-5, rtol=1e-5), (out2, ref1)

    # Case 3: ragged shapes (bsz=6, K=200) — exercises in-kernel column
    # masking and dropped out-of-bounds row writes (no wrapper pad).
    x3 = jax.random.normal(jax.random.PRNGKey(0), (6, 200), dtype=jnp.float32)
    out3 = jax.block_until_ready(nce_softmax_loss_ns(x3, tile_k=128))
    ref3 = _reference(x3)
    assert jnp.allclose(out3, ref3, atol=1e-5, rtol=1e-5), (out3, ref3)

    # Case 4: bf16 logits streamed in native dtype (tile_b rounded to 16).
    x4 = jax.random.normal(jax.random.PRNGKey(1), (8, 384), dtype=jnp.float32)
    x4 = x4.astype(jnp.bfloat16)
    out4 = jax.block_until_ready(nce_softmax_loss_ns(x4))
    ref4 = _reference(x4)
    assert jnp.allclose(out4, ref4, atol=1e-3, rtol=1e-3), (out4, ref4)

    print("KERNEL_OK")
</pallas_src>

<mosaic_0001>
module attributes {stable_mosaic.version = 11 : i64} {
  func.func @_lse_kernel(%arg0: i32, %arg1: i32, %arg2: memref<8x384xf32, #tpu.memory_space<vmem>>, %arg3: memref<8x1xf32, #tpu.memory_space<vmem>>, %arg4: memref<8x1xf32, #tpu.memory_space<vmem>>, %arg5: memref<8x1xf32, #tpu.memory_space<vmem>>) attributes {dimension_semantics = [#tpu.dimension_semantics<parallel>, #tpu.dimension_semantics<arbitrary>], iteration_bounds = array<i64: 1, 1>, scalar_prefetch = 0 : i64, scratch_operands = 2 : i64, tpu.core_type = #tpu.core_type<tc>, window_params = [{transform_indices = @transform_0, window_bounds = array<i64: 8, 384>}, {transform_indices = @transform_1, window_bounds = array<i64: 8, 1>}]} {
    %c0_i32 = arith.constant 0 : i32
    %0 = arith.cmpi eq, %arg1, %c0_i32 : i32
    %1 = arith.extui %0 : i1 to i32
    %c0_i32_0 = arith.constant 0 : i32
    %2 = arith.cmpi ne, %1, %c0_i32_0 : i32
    scf.if %2 {
      %cst_15 = arith.constant 0xFF800000 : f32
      %24 = vector.broadcast %cst_15 : f32 to vector<8x1xf32>
      %c0_16 = arith.constant 0 : index
      %c0_17 = arith.constant 0 : index
      %25 = vector.load %arg4[%c0_16, %c0_17] : memref<8x1xf32, #tpu.memory_space<vmem>>, vector<8x1xf32>
      tpu.vector_store %arg4[%c0_16, %c0_17], %24 {strides = array<i32>} : memref<8x1xf32, #tpu.memory_space<vmem>>, vector<8x1xf32>,
      %cst_18 = arith.constant 0.000000e+00 : f32
      %26 = vector.broadcast %cst_18 : f32 to vector<8x1xf32>
      %c0_19 = arith.constant 0 : index
      %c0_20 = arith.constant 0 : index
      %27 = vector.load %arg5[%c0_19, %c0_20] : memref<8x1xf32, #tpu.memory_space<vmem>>, vector<8x1xf32>
      tpu.vector_store %arg5[%c0_19, %c0_20], %26 {strides = array<i32>} : memref<8x1xf32, #tpu.memory_space<vmem>>, vector<8x1xf32>,
    } else {
    }
    %c0 = arith.constant 0 : index
    %c0_1 = arith.constant 0 : index
    %3 = vector.load %arg2[%c0, %c0_1] : memref<8x384xf32, #tpu.memory_space<vmem>>, vector<8x384xf32>
    %cst = arith.constant dense<0xFF800000> : vector<8xf32>
    %4 = vector.multi_reduction <maximumf>, %3, %cst [1] : vector<8x384xf32> to vector<8xf32>
    %5 = vector.shape_cast %4 : vector<8xf32> to vector<8x1xf32>
    %c0_2 = arith.constant 0 : index
    %c0_3 = arith.constant 0 : index
    %6 = vector.load %arg4[%c0_2, %c0_3] : memref<8x1xf32, #tpu.memory_space<vmem>>, vector<8x1xf32>
    %7 = arith.maximumf %6, %5 : vector<8x1xf32>
    %c0_4 = arith.constant 0 : index
    %c0_5 = arith.constant 0 : index
    %8 = vector.load %arg4[%c0_4, %c0_5] : memref<8x1xf32, #tpu.memory_space<vmem>>, vector<8x1xf32>
    %9 = arith.subf %8, %7 : vector<8x1xf32>
    %10 = math.exp %9 : vector<8x1xf32>
    %11 = vector.broadcast %7 : vector<8x1xf32> to vector<8x384xf32>
    %12 = arith.subf %3, %11 : vector<8x384xf32>
    %13 = math.exp %12 : vector<8x384xf32>
    %c0_6 = arith.constant 0 : index
    %c0_7 = arith.constant 0 : index
    %14 = vector.load %arg5[%c0_6, %c0_7] : memref<8x1xf32, #tpu.memory_space<vmem>>, vector<8x1xf32>
    %15 = arith.mulf %10, %14 : vector<8x1xf32>
    %cst_8 = arith.constant dense<0.000000e+00> : vector<8xf32>
    %16 = vector.multi_reduction <add>, %13, %cst_8 [1] : vector<8x384xf32> to vector<8xf32>
    %17 = vector.shape_cast %16 : vector<8xf32> to vector<8x1xf32>
    %18 = arith.addf %15, %17 : vector<8x1xf32>
    %c0_9 = arith.constant 0 : index
    %c0_10 = arith.constant 0 : index
    %19 = vector.load %arg5[%c0_9, %c0_10] : memref<8x1xf32, #tpu.memory_space<vmem>>, vector<8x1xf32>
    tpu.vector_store %arg5[%c0_9, %c0_10], %18 {strides = array<i32>} : memref<8x1xf32, #tpu.memory_space<vmem>>, vector<8x1xf32>,
    %c0_11 = arith.constant 0 : index
    %c0_12 = arith.constant 0 : index
    %20 = vector.load %arg4[%c0_11, %c0_12] : memref<8x1xf32, #tpu.memory_space<vmem>>, vector<8x1xf32>
    tpu.vector_store %arg4[%c0_11, %c0_12], %7 {strides = array<i32>} : memref<8x1xf32, #tpu.memory_space<vmem>>, vector<8x1xf32>,
    %c0_i32_13 = arith.constant 0 : i32
    %21 = arith.cmpi eq, %arg1, %c0_i32_13 : i32
    %22 = arith.extui %21 : i1 to i32
    %c0_i32_14 = arith.constant 0 : i32
    %23 = arith.cmpi ne, %22, %c0_i32_14 : i32
    scf.if %23 {
      %c0_15 = arith.constant 0 : index
      %c0_16 = arith.constant 0 : index
      %24 = vector.load %arg4[%c0_15, %c0_16] : memref<8x1xf32, #tpu.memory_space<vmem>>, vector<8x1xf32>
      %c0_17 = arith.constant 0 : index
      %c0_18 = arith.constant 0 : index
      %25 = vector.load %arg5[%c0_17, %c0_18] : memref<8x1xf32, #tpu.memory_space<vmem>>, vector<8x1xf32>
      %26 = math.log %25 : vector<8x1xf32>
      %27 = arith.addf %24, %26 : vector<8x1xf32>
      %c0_19 = arith.constant 0 : index
      %c0_20 = arith.constant 0 : index
      %28 = vector.load %arg3[%c0_19, %c0_20] : memref<8x1xf32, #tpu.memory_space<vmem>>, vector<8x1xf32>
      tpu.vector_store %arg3[%c0_19, %c0_20], %27 {strides = array<i32>} : memref<8x1xf32, #tpu.memory_space<vmem>>, vector<8x1xf32>,
    } else {
    }
    return
  }
  func.func @transform_0(%arg0: i32, %arg1: i32) -> (i32, i32) {
    %c0_i32 = arith.constant 0 : i32
    return %arg0, %arg1 : i32, i32
  }
  func.func @transform_1(%arg0: i32, %arg1: i32) -> (i32, i32) {
    %c0_i32 = arith.constant 0 : i32
    %c0_i32_0 = arith.constant 0 : i32
    return %arg0, %c0_i32 : i32, i32
  }
}

</mosaic_0001>

<bundles_post_ra>
// kernel: tpu_custom_call.1
= control target key start
LH: loop header
LB: loop body
LE: loop exit
PB: predicated region body
PF: predicated region fallthrough
CT: control target
= control target key end

     0   :  { %6 = vsyncpa [#allocation5], 0  ;;  %s114_s6 = smov [#allocation4]   ;;  %s139_s0 = inlined_call_operand.hbm [shape: f32[8,384], index: 0, kind: input, shape index: {}]   ;;  %s140_s1 = inlined_call_operand.vmem [shape: f32[8,1], index: 1, kind: output, shape index: {}]  }
   0x1   :  { %s13_s7 = sshll.u32 %s114_s6, 4  ;;  %s14_s7 = int_to_ptr.vmem [resolvable:$true] %s13_s7 }
   0x2   :  { %s100_s8 = scalar_lea.vmem %s14_s7, 384  ;;  %p105_p1 = scmp.lt.s32.totalorder %s14_s7, %s14_s7 }
   0x3   :  { %p101_p0 = scmp.ne.s32.totalorder %s14_s7, %s100_s8  ;;  %p106_p2 = scmp.lt.s32.totalorder %s100_s8, %s100_s8 }
   0x5   :  { %p107_p3 = por %p106_p2, %p105_p1 }
   0x7   :  { %p108_p4 = pnand %p107_p3, %p101_p0 }
   0x9   :  { %111 = shalt.err (!%p108_p4)
}
   0xa   :  { %16 = dma.hbm_to_vmem [thread:$0]  %s139_s0, 384, %s14_s7, [#allocation5]  }
   0xb   :  { %112 = dma.done.wait [#allocation5], 384  }
   0xc   :  { %113 = vsyncadd [#allocation5], 4294966912  ;;  %vm24_vm0 = vcmask 7168   ;;  %v115_v0 = vmov -inf   ;;  %v27_v1 = vld [vmem:[#allocation4] sm:$0xff]  ;;  %v28_v2 = vld [vmem:[#allocation4 + $0x8] sm:$0xff] }
   0xd   :  { %25 = vst.msk [vmem:[#allocation2] sm:$0xff] %vm24_vm0, %v115_v0  ;;  %v29_v3 = vld [vmem:[#allocation4 + $0x10] sm:$0xff]  ;;  %v30_v4 = vmax.f32 %v27_v1, %v28_v2  ;;  %v116_v6 = vmov 0   ;;  %v117_v7 = vmov 0.0  }
   0xe   :  { %81 = vset.pattern.permute.xlu0 %v116_v6  ;;  %26 = vst.msk [vmem:[#allocation3] sm:$0xff] %vm24_vm0, %v117_v7 }
   0xf   :  { %v31_v5 = vmax.f32 %v30_v4, %v29_v3 }
  0x11   :  { %32 = vmax.xlane.f32.xlu0 %v31_v5 }
  0x14   :  { %v34_v8 = vld [vmem:[#allocation2] sm:$0xff] }
  0x15   :  { %v53_v26 = vld [vmem:[#allocation3] sm:$0xff] }
  0x9a   :  { %v33_v9 = vpop.xlane.xlu0 %32 }
  0x9b   :  { %v35_v10 = vmax.f32 %v34_v8, %v33_v9 }
  0x9d   :  { %v36_v11 = vsub.f32 %v34_v8, %v35_v10  ;;  %62 = vst.msk [vmem:[#allocation2] sm:$0xff] %vm24_vm0, %v35_v10  ;;  %41 = vperm.xlu0 %81, %v35_v10  }
  0x9f   :  { %v37_v24 = vmul.f32 1.442695, %v36_v11 }
  0xa4   :  { %v66_v33 = vld [vmem:[#allocation2] sm:$0xff] }
 0x118   :  { %v42_v12 = vpop.permute.xlu0 %41 }
 0x119   :  { %v44_v13 = vsub.f32 %v27_v1, %v42_v12  ;;  %v45_v14 = vsub.f32 %v28_v2, %v42_v12  ;;  %v46_v15 = vsub.f32 %v29_v3, %v42_v12 }
 0x11b   :  { %v47_v16 = vmul.f32 1.442695, %v44_v13  ;;  %v49_v17 = vmul.f32 1.442695, %v45_v14  ;;  %v51_v18 = vmul.f32 1.442695, %v46_v15 }
 0x11d   :  { %82 = vpow2.f32 %v47_v16 }
 0x11e   :  { %84 = vpow2.f32 %v49_v17 }
 0x11f   :  { %86 = vpow2.f32 %v51_v18 }
 0x120   :  { %88 = vpow2.f32 %v37_v24 }
 0x12a   :  { %v83_v19 = vpop.eup %82 }
 0x12b   :  { %v85_v20 = vpop.eup %84 }
 0x12c   :  { %v55_v21 = vadd.f32 %v85_v20, %v83_v19  ;;  %v87_v22 = vpop.eup %86 }
 0x12d   :  { %v89_v25 = vpop.eup %88 }
 0x12e   :  { %v56_v23 = vadd.f32 %v87_v22, %v55_v21  ;;  %v54_v27 = vmul.f32 %v89_v25, %v53_v26 }
 0x130   :  { %57 = vadd.xlane.f32.xlu1 %v56_v23 }
 0x1b9   :  { %v58_v28 = vpop.xlane.xlu1 %57 }
 0x1ba   :  { %v59_v29 = vadd.f32 %v58_v28, %v54_v27 }
 0x1bc   :  { %61 = vst.msk [vmem:[#allocation3] sm:$0xff] %vm24_vm0, %v59_v29 }
 0x1c3   :  { %v67_v30 = vld [vmem:[#allocation3] sm:$0xff] }
 0x1c4   :  { %90 = vlog2.f32 %v67_v30 }
 0x1d1   :  { %v91_v31 = vpop.eup %90 }
 0x1d2   :  { %v69_v32 = vmul.f32 0.6931472, %v91_v31 }
 0x1d4   :  { %v70_v34 = vadd.f32 %v69_v32, %v66_v33 }
 0x1d6   :  { %71 = vst.msk [vmem:[%s140_s1] sm:$0xff] %vm24_vm0, %v70_v34 }
 0x1d7   :  { %76 = vsyncpa [#allocation5], 1 }

</bundles_post_ra>
